<compile_context>
chip_gen: v7x
topology: tpu7x:2x2x1
jax: 0.10.0
libtpu: 0.0.40
codegen_flags: <defaults>
</compile_context>

<pallas_src>
import jax
import jax.numpy as jnp
from jax.experimental import pallas as pl
from jax.experimental.pallas import tpu as pltpu


# ----------------------------------------------------------------------------
# Pallas kernel: fused proj_disc / proj_diff MLPs + IRT prediction
# ----------------------------------------------------------------------------
def _irt_kernel(xT_ref, prof_ref, w1_ref, b1_ref, w2_ref, b2_ref, out_ref):
    """Fused IRT head, feature-major (batch-on-lanes) layout.

    xT_ref  : [D, TB]  bf16  exercise embeddings (batch along lanes)
    prof_ref: [1, TB]  f32   student proficiency
    w1_ref  : [3D, D]  bf16  packed first-layer weights (disc ++ diff)
    b1_ref  : [3D, 1]  f32   packed first-layer bias
    w2_ref  : [2, 3D]  bf16  block-diagonal packed second-layer weights
    b2_ref  : [2, 1]   f32   packed second-layer bias
    out_ref : [1, TB]  f32   predicted probability
    """
    xT = xT_ref[...]
    prof = prof_ref[...]

    # Fused first layers of proj_disc and proj_diff: one MXU matmul + one
    # sigmoid pass over [3D, TB] (instead of two narrower matmuls/sigmoids).
    h = jax.nn.sigmoid(
        jnp.dot(w1_ref[...], xT, preferred_element_type=jnp.float32)
        + b1_ref[...])

    # Fused second (N=1) projections: block-diagonal packing gives both heads
    # in a single lane-dense [2, TB] matmul (row 0: disc, row 1: diff).
    z = jnp.dot(w2_ref[...], h.astype(w2_ref.dtype),
                preferred_element_type=jnp.float32) + b2_ref[...]
    a = jax.nn.sigmoid(z[0:1, :])   # discrimination
    b = z[1:2, :]                   # difficulty

    # output = 1 / (1 + exp(-1.703 * a * (proficiency - b)))
    out_ref[...] = jax.nn.sigmoid(1.703 * a * (prof - b))


# ----------------------------------------------------------------------------
# Wrapper: tile the batch and call the kernel
# ----------------------------------------------------------------------------
_TB_TARGET = 512  # batch-lane tile; sits well inside v7x's 64 MiB VMEM


def irt_head_pallas(exer_emb, proficiency, packed):
    """Run the fused IRT head.

    exer_emb    : [B, D] f32
    proficiency : [B, 1] f32
    packed      : dict of pre-packed kernel weights (see pack_irt_params)
    """
    B, D = exer_emb.shape
    f32, bf16 = jnp.float32, jnp.bfloat16

    # --- feature-major (lane-dense batch) activation layout ----------------
    xT = exer_emb.T.astype(bf16)                # [D, B]  (bf16 matmul path)
    prof_row = proficiency.reshape(1, B)        # [1, B]  (f32)

    if B <= _TB_TARGET:
        TB, B_pad = B, B                        # single full-extent tile
    else:
        TB = _TB_TARGET
        B_pad = pl.cdiv(B, TB) * TB
    if B_pad != B:
        xT = jnp.pad(xT, ((0, 0), (0, B_pad - B)))
        prof_row = jnp.pad(prof_row, ((0, 0), (0, B_pad - B)))

    out = pl.pallas_call(
        _irt_kernel,
        out_shape=jax.ShapeDtypeStruct((1, B_pad), f32),
        grid=(B_pad // TB,),
        in_specs=[
            pl.BlockSpec((D, TB), lambda i: (0, i)),       # xT: batch-tiled
            pl.BlockSpec((1, TB), lambda i: (0, i)),       # proficiency
            pl.BlockSpec((3 * D, D), lambda i: (0, 0)),    # w1 (VMEM-resident)
            pl.BlockSpec((3 * D, 1), lambda i: (0, 0)),    # b1
            pl.BlockSpec((2, 3 * D), lambda i: (0, 0)),    # w2
            pl.BlockSpec((2, 1), lambda i: (0, 0)),        # b2
        ],
        out_specs=pl.BlockSpec((1, TB), lambda i: (0, i)),
        compiler_params=pltpu.CompilerParams(
            dimension_semantics=("parallel",),
            vmem_limit_bytes=32 * 1024 * 1024),
    )(xT, prof_row, packed["w1"], packed["b1"], packed["w2"], packed["b2"])

    return out[0, :B]                            # [B]


# ----------------------------------------------------------------------------
# Parameter construction (deterministic, matching the module's __init__ shapes)
# ----------------------------------------------------------------------------
def xavier_uniform(key, fan_in, fan_out):
    limit = jnp.sqrt(6.0 / (fan_in + fan_out))
    # stored as [in, out] (transposed vs PyTorch nn.Linear.weight)
    return jax.random.uniform(key, (fan_in, fan_out), jnp.float32, -limit, limit)


def pack_irt_params(params):
    """Pack the two MLP heads into fused kernel tensors. Done ONCE, not per call."""
    f32, bf16 = jnp.float32, jnp.bfloat16
    D = params["w1_diff"].shape[0]
    w1T = jnp.concatenate([params["w1_disc"].T, params["w1_diff"].T], axis=0)   # [3D, D]
    b1 = jnp.concatenate([params["b1_disc"], params["b1_diff"]], axis=1).T      # [3D, 1]
    w2T = jnp.concatenate(
        [jnp.concatenate([params["w2_disc"].T, jnp.zeros((1, D), f32)], axis=1),
         jnp.concatenate([jnp.zeros((1, 2 * D), f32), params["w2_diff"].T], axis=1)],
        axis=0)                                                                 # [2, 3D]
    b2 = jnp.concatenate([params["b2_disc"], params["b2_diff"]], axis=0)        # [2, 1]
    return {"w1": w1T.astype(bf16), "b1": b1,
            "w2": w2T.astype(bf16), "b2": b2}


def make_params(key, num_students, num_exercises, d_model):
    k = jax.random.split(key, 8)
    # TODO(synk): frozen BERT exercise embeddings are a deterministic random
    # table here instead of loading the .npy checkpoint referenced in __init__.
    bert_emb = jax.random.normal(k[0], (num_exercises, d_model), jnp.float32)
    stu_emb = 0.1 * jax.random.normal(k[1], (num_students, 1), jnp.float32)
    params = {
        "bert_emb": bert_emb,
        "stu_emb": stu_emb,
        # proj_disc: Linear(D, 2D) -> Sigmoid -> Linear(2D, 1)
        "w1_disc": xavier_uniform(k[2], d_model, 2 * d_model),
        "b1_disc": jnp.zeros((1, 2 * d_model), jnp.float32),
        "w2_disc": xavier_uniform(k[3], 2 * d_model, 1),
        "b2_disc": jnp.zeros((1, 1), jnp.float32),
        # proj_diff: Linear(D, D) -> Sigmoid -> Linear(D, 1)
        "w1_diff": xavier_uniform(k[4], d_model, d_model),
        "b1_diff": jnp.zeros((1, d_model), jnp.float32),
        "w2_diff": xavier_uniform(k[5], d_model, 1),
        "b2_diff": jnp.zeros((1, 1), jnp.float32),
    }
    params["packed"] = pack_irt_params(params)
    return params


# ----------------------------------------------------------------------------
# Forward (matches Baseline_IRT.forward)
# ----------------------------------------------------------------------------
@jax.jit
def baseline_irt_forward(params, stu_ids, exer_in):
    proficiency = params["stu_emb"][stu_ids]   # [B, 1]  (nn.Embedding lookup)
    exer_emb = params["bert_emb"][exer_in]     # [B, D]  (frozen embedding lookup)
    # TODO(synk): folding the gather into the kernel (PrefetchScalarGridSpec +
    # row index_map) only pays off at real BERT widths; kept in plain JAX here.
    output = irt_head_pallas(exer_emb, proficiency, params["packed"])   # [B]
    return output, exer_emb, proficiency


# Pure-JAX f32 reference for a sanity check
def reference_forward(params, stu_ids, exer_in):
    proficiency = params["stu_emb"][stu_ids]
    exer_emb = params["bert_emb"][exer_in]
    h_disc = jax.nn.sigmoid(exer_emb @ params["w1_disc"] + params["b1_disc"])
    a = jax.nn.sigmoid(h_disc @ params["w2_disc"] + params["b2_disc"])
    h_diff = jax.nn.sigmoid(exer_emb @ params["w1_diff"] + params["b1_diff"])
    b = h_diff @ params["w2_diff"] + params["b2_diff"]
    output = 1.0 / (1.0 + jnp.exp(-1.703 * a * (proficiency - b)))
    return output[:, 0], exer_emb, proficiency


if __name__ == "__main__":
    key = jax.random.PRNGKey(0)
    num_students, num_exercises, d_model = 16, 20, 32

    params = make_params(key, num_students, num_exercises, d_model)

    # batch=8: single full-extent tile; batch=600: padded, 2-step batch grid.
    for batch in (8, 600):
        k1, k2 = jax.random.split(jax.random.fold_in(key, batch))
        stu_ids = jax.random.randint(k1, (batch,), 0, num_students, jnp.int32)
        exer_in = jax.random.randint(k2, (batch,), 0, num_exercises, jnp.int32)

        output, exer_emb, proficiency = baseline_irt_forward(params, stu_ids, exer_in)
        jax.block_until_ready(output)

        ref_out, ref_emb, ref_prof = reference_forward(params, stu_ids, exer_in)
        assert output.shape == (batch,)
        assert exer_emb.shape == (batch, d_model)
        assert proficiency.shape == (batch, 1)
        # bf16 matmul path -> tolerance loosened vs the pure-f32 reference
        assert jnp.allclose(output, ref_out, atol=2e-2, rtol=2e-2)
        assert jnp.allclose(exer_emb, ref_emb)
        assert jnp.allclose(proficiency, ref_prof)

    print("KERNEL_OK")
</pallas_src>

<mosaic_0001>
module attributes {stable_mosaic.version = 11 : i64} {
  func.func @_irt_kernel(%arg0: i32, %arg1: memref<32x8xbf16, #tpu.memory_space<vmem>>, %arg2: memref<1x8xf32, #tpu.memory_space<vmem>>, %arg3: memref<96x32xbf16, #tpu.memory_space<vmem>>, %arg4: memref<96x1xf32, #tpu.memory_space<vmem>>, %arg5: memref<2x96xbf16, #tpu.memory_space<vmem>>, %arg6: memref<2x1xf32, #tpu.memory_space<vmem>>, %arg7: memref<1x8xf32, #tpu.memory_space<vmem>>) attributes {dimension_semantics = [#tpu.dimension_semantics<parallel>], iteration_bounds = array<i64: 1>, scalar_prefetch = 0 : i64, scratch_operands = 0 : i64, tpu.core_type = #tpu.core_type<tc>, window_params = [{transform_indices = @transform_0, window_bounds = array<i64: 32, 8>}, {transform_indices = @transform_1, window_bounds = array<i64: 1, 8>}, {pipeline_mode = #tpu.pipeline_mode<synchronous>, transform_indices = @transform_2, window_bounds = array<i64: 96, 32>}, {pipeline_mode = #tpu.pipeline_mode<synchronous>, transform_indices = @transform_3, window_bounds = array<i64: 96, 1>}, {pipeline_mode = #tpu.pipeline_mode<synchronous>, transform_indices = @transform_4, window_bounds = array<i64: 2, 96>}, {pipeline_mode = #tpu.pipeline_mode<synchronous>, transform_indices = @transform_5, window_bounds = array<i64: 2, 1>}, {transform_indices = @transform_6, window_bounds = array<i64: 1, 8>}]} {
    %c0 = arith.constant 0 : index
    %c0_0 = arith.constant 0 : index
    %0 = vector.load %arg1[%c0, %c0_0] : memref<32x8xbf16, #tpu.memory_space<vmem>>, vector<32x8xbf16>
    %c0_1 = arith.constant 0 : index
    %c0_2 = arith.constant 0 : index
    %1 = vector.load %arg2[%c0_1, %c0_2] : memref<1x8xf32, #tpu.memory_space<vmem>>, vector<1x8xf32>
    %c0_3 = arith.constant 0 : index
    %c0_4 = arith.constant 0 : index
    %2 = vector.load %arg3[%c0_3, %c0_4] : memref<96x32xbf16, #tpu.memory_space<vmem>>, vector<96x32xbf16>
    %cst = arith.constant dense<0.000000e+00> : vector<96x8xf32>
    %3 = tpu.matmul %2, %0, %cst {dimension_numbers = #tpu.dot_dimension_numbers<[1], [0], [0], [1], [0, 0, 1, 1], [], []>} : vector<96x32xbf16>, vector<32x8xbf16>, vector<96x8xf32> -> vector<96x8xf32>
    %c0_5 = arith.constant 0 : index
    %c0_6 = arith.constant 0 : index
    %4 = vector.load %arg4[%c0_5, %c0_6] : memref<96x1xf32, #tpu.memory_space<vmem>>, vector<96x1xf32>
    %5 = vector.broadcast %4 : vector<96x1xf32> to vector<96x8xf32>
    %6 = arith.addf %3, %5 : vector<96x8xf32>
    %7 = arith.negf %6 : vector<96x8xf32>
    %8 = math.exp %7 : vector<96x8xf32>
    %cst_7 = arith.constant 1.000000e+00 : f32
    %9 = vector.broadcast %cst_7 : f32 to vector<96x8xf32>
    %10 = arith.addf %9, %8 : vector<96x8xf32>
    %11 = arith.divf %9, %10 : vector<96x8xf32>
    %c0_8 = arith.constant 0 : index
    %c0_9 = arith.constant 0 : index
    %12 = vector.load %arg5[%c0_8, %c0_9] : memref<2x96xbf16, #tpu.memory_space<vmem>>, vector<2x96xbf16>
    %13 = arith.truncf %11 : vector<96x8xf32> to vector<96x8xbf16>
    %cst_10 = arith.constant dense<0.000000e+00> : vector<2x8xf32>
    %14 = tpu.matmul %12, %13, %cst_10 {dimension_numbers = #tpu.dot_dimension_numbers<[1], [0], [0], [1], [0, 0, 1, 1], [], []>} : vector<2x96xbf16>, vector<96x8xbf16>, vector<2x8xf32> -> vector<2x8xf32>
    %c0_11 = arith.constant 0 : index
    %c0_12 = arith.constant 0 : index
    %15 = vector.load %arg6[%c0_11, %c0_12] : memref<2x1xf32, #tpu.memory_space<vmem>>, vector<2x1xf32>
    %16 = vector.broadcast %15 : vector<2x1xf32> to vector<2x8xf32>
    %17 = arith.addf %14, %16 : vector<2x8xf32>
    %18 = vector.extract_strided_slice %17 {offsets = [0, 0], sizes = [1, 8], strides = [1, 1]} : vector<2x8xf32> to vector<1x8xf32>
    %19 = arith.negf %18 : vector<1x8xf32>
    %20 = math.exp %19 : vector<1x8xf32>
    %cst_13 = arith.constant 1.000000e+00 : f32
    %21 = vector.broadcast %cst_13 : f32 to vector<1x8xf32>
    %22 = arith.addf %21, %20 : vector<1x8xf32>
    %23 = arith.divf %21, %22 : vector<1x8xf32>
    %24 = vector.extract_strided_slice %17 {offsets = [1, 0], sizes = [1, 8], strides = [1, 1]} : vector<2x8xf32> to vector<1x8xf32>
    %cst_14 = arith.constant 1.703000e+00 : f32
    %25 = vector.broadcast %cst_14 : f32 to vector<1x8xf32>
    %26 = arith.mulf %25, %23 : vector<1x8xf32>
    %27 = arith.subf %1, %24 : vector<1x8xf32>
    %28 = arith.mulf %26, %27 : vector<1x8xf32>
    %29 = arith.negf %28 : vector<1x8xf32>
    %30 = math.exp %29 : vector<1x8xf32>
    %cst_15 = arith.constant 1.000000e+00 : f32
    %31 = vector.broadcast %cst_15 : f32 to vector<1x8xf32>
    %32 = arith.addf %31, %30 : vector<1x8xf32>
    %33 = arith.divf %31, %32 : vector<1x8xf32>
    %c0_16 = arith.constant 0 : index
    %c0_17 = arith.constant 0 : index
    %34 = vector.load %arg7[%c0_16, %c0_17] : memref<1x8xf32, #tpu.memory_space<vmem>>, vector<1x8xf32>
    tpu.vector_store %arg7[%c0_16, %c0_17], %33 {strides = array<i32>} : memref<1x8xf32, #tpu.memory_space<vmem>>, vector<1x8xf32>,
    return
  }
  func.func @transform_0(%arg0: i32) -> (i32, i32) {
    %c0_i32 = arith.constant 0 : i32
    %c0_i32_0 = arith.constant 0 : i32
    return %c0_i32, %arg0 : i32, i32
  }
  func.func @transform_1(%arg0: i32) -> (i32, i32) {
    %c0_i32 = arith.constant 0 : i32
    %c0_i32_0 = arith.constant 0 : i32
    return %c0_i32, %arg0 : i32, i32
  }
  func.func @transform_2(%arg0: i32) -> (i32, i32) {
    %c0_i32 = arith.constant 0 : i32
    %c0_i32_0 = arith.constant 0 : i32
    %c0_i32_1 = arith.constant 0 : i32
    return %c0_i32, %c0_i32_0 : i32, i32
  }
  func.func @transform_3(%arg0: i32) -> (i32, i32) {
    %c0_i32 = arith.constant 0 : i32
    %c0_i32_0 = arith.constant 0 : i32
    %c0_i32_1 = arith.constant 0 : i32
    return %c0_i32, %c0_i32_0 : i32, i32
  }
  func.func @transform_4(%arg0: i32) -> (i32, i32) {
    %c0_i32 = arith.constant 0 : i32
    %c0_i32_0 = arith.constant 0 : i32
    %c0_i32_1 = arith.constant 0 : i32
    return %c0_i32, %c0_i32_0 : i32, i32
  }
  func.func @transform_5(%arg0: i32) -> (i32, i32) {
    %c0_i32 = arith.constant 0 : i32
    %c0_i32_0 = arith.constant 0 : i32
    %c0_i32_1 = arith.constant 0 : i32
    return %c0_i32, %c0_i32_0 : i32, i32
  }
  func.func @transform_6(%arg0: i32) -> (i32, i32) {
    %c0_i32 = arith.constant 0 : i32
    %c0_i32_0 = arith.constant 0 : i32
    return %c0_i32, %arg0 : i32, i32
  }
}

</mosaic_0001>

<bundles_post_ra>
// kernel: baseline_irt_forward.1
= control target key start
LH: loop header
LB: loop body
LE: loop exit
PB: predicated region body
PF: predicated region fallthrough
CT: control target
= control target key end

     0   :  { %vm156_vm0 = vcmask 261120   ;;  %v604_v3 = vmov 0   ;;  %s738_s0 = inlined_call_operand.vmem [shape: bf16[32,8], index: 0, kind: input, shape index: {}]   ;;  %s739_s1 = inlined_call_operand.vmem [shape: f32[1,8], index: 1, kind: input, shape index: {}]   ;;  %s740_s2 = inlined_call_operand.vmem [shape: bf16[96,32], index: 2, kind: input, shape index: {}]   ;;  %s741_s3 = inlined_call_operand.vmem [shape: f32[96,1], index: 3, kind: input, shape index: {}]   ;;  %s742_s4 = inlined_call_operand.vmem [shape: bf16[2,96], index: 4, kind: input, shape index: {}]   ;;  %s743_s5 = inlined_call_operand.vmem [shape: f32[2,1], index: 5, kind: input, shape index: {}]   ;;  %s744_s6 = inlined_call_operand.hbm [shape: f32[1,8], index: 6, kind: output, shape index: {}]  }
   0x1   :  { %v516_v0 = vld [vmem:[%s738_s0] sm:$0xff]   ;;  %v517_v1 = vld [vmem:[%s738_s0 + $0x8] sm:$0xff]   ;;  %514 = vset.pattern.permute.xlu0 %v604_v3  ;;  %515 = vset.pattern.permute.xlu1 %v604_v3  ;;  %v520_v5 = vld [vmem:[%s740_s2 + $0x10] sm:$0xff]  }
   0x2   :  { %477 = vmatprep.subr.bf16.mxu0 %v516_v0  ;;  %v518_v2 = vld [vmem:[%s740_s2] sm:$0xff]   ;;  %v519_v4 = vld [vmem:[%s740_s2 + $0x8] sm:$0xff]   ;;  %v44_v7 = vld [vmem:[%s741_s3 + $0x10] sm:$0xff] }
   0x3   :  { %478 = vmatpush3.bf16.msra.mxu0 %v516_v0  ;;  %481 = vmatprep.mubr.msk.bf16.mxu0 %vm156_vm0, %v518_v2  ;;  %v42_v6 = vld [vmem:[%s741_s3] sm:$0xff]  ;;  %v43_v8 = vld [vmem:[%s741_s3 + $0x8] sm:$0xff]  ;;  %v45_v9 = vld [vmem:[%s741_s3 + $0x18] sm:$0xff] }
   0x4   :  { %479 = vmatprep.subr.bf16.mxu0 %v517_v1  ;;  %56 = vperm.xlu0 %514, %v42_v6  }
   0x5   :  { %66 = vperm.xlu1 %515, %v44_v7  }
   0x7   :  { %480 = vmatpush3.bf16.msra.mxu0 %v517_v1 }
   0xa   :  { %482 = vmatmul.mubr.msk.bf16.vlgmr.msra.gmra.mrb[0].mxu0 %vm156_vm0, %v519_v4 }
   0xb   :  { %485 = vmatprep.mubr.msk.bf16.mxu0 %vm156_vm0, %v520_v5 }
   0xc   :  { %11 = vsyncpa [#allocation3], 0  ;;  %61 = vperm.xlu0 %514, %v43_v8   ;;  %71 = vperm.xlu1 %515, %v45_v9   ;;  %v521_v10 = vld [vmem:[%s740_s2 + $0x18] sm:$0xff]   ;;  %v46_v11 = vld [vmem:[%s741_s3 + $0x20] sm:$0xff]  ;;  %v605_v22 = vmov 0.0   ;;  %vm606_vm1 = vmmov 0  }
   0xd   :  { %v47_v12 = vld [vmem:[%s741_s3 + $0x28] sm:$0xff]  ;;  %v522_v13 = vld [vmem:[%s740_s2 + $0x20] sm:$0xff]   ;;  %v48_v14 = vld [vmem:[%s741_s3 + $0x30] sm:$0xff]  ;;  %493 = vmatprep.subr.bf16.mxu1 %v605_v22  ;;  %505 = vmatprep.mubr.msk.bf16.mxu1 %vm606_vm1, %v605_v22  ;;  %vm341_vm2 = vcmask 785408   ;;  %s608_s13 = smov [#allocation2]   ;;  %vm417_vm3 = vcmask 57344  }
   0xe   :  { %v49_v15 = vld [vmem:[%s741_s3 + $0x38] sm:$0xff]  ;;  %v523_v16 = vld [vmem:[%s740_s2 + $0x28] sm:$0xff]   ;;  %v50_v17 = vld [vmem:[%s741_s3 + $0x40] sm:$0xff]  ;;  %s425_s14 = sshll.u32 %s608_s13, 4  ;;  %s426_s14 = int_to_ptr.vmem [resolvable:$true] %s425_s14 }
   0xf   :  { %v51_v18 = vld [vmem:[%s741_s3 + $0x48] sm:$0xff]  ;;  %v52_v19 = vld [vmem:[%s741_s3 + $0x50] sm:$0xff]  ;;  %v53_v20 = vld [vmem:[%s741_s3 + $0x58] sm:$0xff]  ;;  %s580_s15 = scalar_lea.vmem %s426_s14, 16  ;;  %s584_s16 = scalar_lea.vmem %s426_s14, 32 }
  0x10   :  { %76 = vperm.xlu0 %514, %v46_v11   ;;  %81 = vperm.xlu1 %515, %v47_v12   ;;  %v335_v21 = vld [vmem:[%s743_s5] sm:$0x3]  ;;  %p581_p0 = scmp.ne.s32.totalorder %s426_s14, %s580_s15  ;;  %p585_p1 = scmp.lt.s32.totalorder %s426_s14, %s426_s14 }
  0x11   :  { %p586_p2 = scmp.lt.s32.totalorder %s584_s16, %s580_s15 }
  0x12   :  { %486 = vmatmul.mubr.msk.bf16.gmra.mrb[4].mxu0 %vm156_vm0, %v521_v10 }
  0x13   :  { %489 = vmatprep.mubr.msk.bf16.mxu0 %vm156_vm0, %v522_v13  ;;  %p587_p3 = por %p586_p2, %p585_p1 }
  0x14   :  { %86 = vperm.xlu0 %514, %v48_v14   ;;  %91 = vperm.xlu1 %515, %v49_v15  }
  0x15   :  { %p588_p4 = pnand %p587_p3, %p581_p0 }
  0x18   :  { %96 = vperm.xlu0 %514, %v50_v17   ;;  %101 = vperm.xlu1 %515, %v51_v18  }
  0x1a   :  { %490 = vmatmul.mubr.msk.bf16.gmra.mrb[8].mxu0 %vm156_vm0, %v523_v16 }
  0x1c   :  { %106 = vperm.xlu0 %514, %v52_v19   ;;  %111 = vperm.xlu1 %515, %v53_v20  }
  0x20   :  { %338 = vperm.xlu0 %514, %v335_v21  }
  0x83   :  { %v57_v23 = vpop.permute.xlu0 %56 }
  0x84   :  { %v67_v24 = vpop.permute.xlu1 %66 }
  0x8b   :  { %v62_v25 = vpop.permute.xlu0 %61  ;;  %v72_v26 = vpop.permute.xlu1 %71 }
  0x8f   :  { %v77_v27 = vpop.permute.xlu0 %76  ;;  %v82_v28 = vpop.permute.xlu1 %81 }
  0x93   :  { %v87_v37 = vpop.permute.xlu0 %86  ;;  %v92_v41 = vpop.permute.xlu1 %91 }
  0x97   :  { %v97_v46 = vpop.permute.xlu0 %96  ;;  %v102_v52 = vpop.permute.xlu1 %101 }
  0x9b   :  { %v107_v59 = vpop.permute.xlu0 %106  ;;  %v112_v4 = vpop.permute.xlu1 %111 }
  0xdd   :  { %v483_v29 = vpop.f32.mrb[0].mxu0 }
  0xde   :  { %v218_v30 = vadd.f32 %v483_v29, %v67_v24  ;;  %v209_v31 = vpop.f32.mrb[1].mxu0 }
  0xdf   :  { %v210_v32 = vadd.f32 %v209_v31, %v57_v23  ;;  %v484_v33 = vpop.f32.mrb[2].mxu0 }
  0xe0   :  { %v449_v34 = vmul.f32 -1.442695, %v218_v30  ;;  %v221_v35 = vadd.f32 %v484_v33, %v72_v26  ;;  %v212_v36 = vpop.f32.mrb[3].mxu0 }
  0xe1   :  { %v447_v38 = vmul.f32 -1.442695, %v210_v32  ;;  %v213_v39 = vadd.f32 %v212_v36, %v62_v25 }
  0xe2   :  { %524 = vpow2.f32 %v449_v34  ;;  %v450_v40 = vmul.f32 -1.442695, %v221_v35 }
  0xe3   :  { %526 = vpow2.f32 %v447_v38  ;;  %v448_v42 = vmul.f32 -1.442695, %v213_v39 }
  0xe4   :  { %528 = vpow2.f32 %v450_v40 }
  0xe5   :  { %530 = vpow2.f32 %v448_v42  ;;  %v487_v43 = vpop.f32.mrb[4].mxu0 }
  0xe6   :  { %v234_v44 = vadd.f32 %v487_v43, %v87_v37  ;;  %v225_v45 = vpop.f32.mrb[5].mxu0 }
  0xe7   :  { %v226_v47 = vadd.f32 %v225_v45, %v77_v27  ;;  %v488_v48 = vpop.f32.mrb[6].mxu0 }
  0xe8   :  { %v453_v49 = vmul.f32 -1.442695, %v234_v44  ;;  %v237_v50 = vadd.f32 %v488_v48, %v92_v41  ;;  %v228_v51 = vpop.f32.mrb[7].mxu0 }
  0xe9   :  { %v451_v53 = vmul.f32 -1.442695, %v226_v47  ;;  %v229_v54 = vadd.f32 %v228_v51, %v82_v28  ;;  %v339_v51 = vpop.permute.xlu0 %338 }
  0xea   :  { %532 = vpow2.f32 %v453_v49  ;;  %v454_v55 = vmul.f32 -1.442695, %v237_v50  ;;  %v328_v50 = vld [vmem:[%s742_s4] sm:$0x1] }
  0xeb   :  { %534 = vpow2.f32 %v451_v53  ;;  %v452_v56 = vmul.f32 -1.442695, %v229_v54 }
  0xec   :  { %v525_v57 = vpop.eup %524  ;;  %536 = vpow2.f32 %v454_v55 }
  0xed   :  { %v527_v58 = vpop.eup %526  ;;  %v294_v60 = vadd.f32 1.0, %v525_v57  ;;  %538 = vpow2.f32 %v452_v56  ;;  %v491_v61 = vpop.f32.mrb[8].mxu0 }
  0xee   :  { %v529_v62 = vpop.eup %528  ;;  %v292_v63 = vadd.f32 1.0, %v527_v58  ;;  %v250_v0 = vadd.f32 %v491_v61, %v107_v59  ;;  %v241_v1 = vpop.f32.mrb[9].mxu0  ;;  %v607_v58 = vmov 1966171168  }
  0xef   :  { %v531_v2 = vpop.eup %530  ;;  %540 = vrcp.f32 %v294_v60  ;;  %v295_v3 = vadd.f32 1.0, %v529_v62  ;;  %v242_v5 = vadd.f32 %v241_v1, %v97_v46  ;;  %v492_v6 = vpop.f32.mrb[10].mxu0  ;;  %v394_v59 = vunpack.c.l.s4 %v607_v58 }
  0xf0   :  { %542 = vrcp.f32 %v292_v63  ;;  %v293_v7 = vadd.f32 1.0, %v531_v2  ;;  %v457_v8 = vmul.f32 -1.442695, %v250_v0  ;;  %v253_v9 = vadd.f32 %v492_v6, %v112_v4  ;;  %v244_v10 = vpop.f32.mrb[11].mxu0  ;;  %v29_v4 = vld [vmem:[%s739_s1] sm:$0x1] }
  0xf1   :  { %544 = vrcp.f32 %v295_v3  ;;  %v455_v11 = vmul.f32 -1.442695, %v242_v5  ;;  %v245_v12 = vadd.f32 %v244_v10, %v102_v52  ;;  %v396_v60 = vlaneseq }
  0xf2   :  { %546 = vrcp.f32 %v293_v7  ;;  %v458_v13 = vmul.f32 -1.442695, %v253_v9  ;;  %v395_v61 = vunpack.c.0.s8 %v394_v59 }
  0xf3   :  { %548 = vpow2.f32 %v457_v8  ;;  %v456_v14 = vmul.f32 -1.442695, %v245_v12 }
  0xf4   :  { %v533_v15 = vpop.eup %532  ;;  %550 = vpow2.f32 %v455_v11 }
  0xf5   :  { %v535_v16 = vpop.eup %534  ;;  %v298_v17 = vadd.f32 1.0, %v533_v15  ;;  %552 = vpow2.f32 %v458_v13 }
  0xf6   :  { %v537_v18 = vpop.eup %536  ;;  %v296_v19 = vadd.f32 1.0, %v535_v16  ;;  %554 = vpow2.f32 %v456_v14 }
  0xf7   :  { %v539_v20 = vpop.eup %538  ;;  %556 = vrcp.f32 %v298_v17  ;;  %v299_v21 = vadd.f32 1.0, %v537_v18 }
  0xf8   :  { %558 = vrcp.f32 %v296_v19  ;;  %v297_v23 = vadd.f32 1.0, %v539_v20 }
  0xf9   :  { %v541_v24 = vpop.eup %540  ;;  %560 = vrcp.f32 %v299_v21 }
  0xfa   :  { %v543_v25 = vpop.eup %542  ;;  %562 = vrcp.f32 %v297_v23 }
  0xfb   :  { %v545_v26 = vpop.eup %544 }
  0xfc   :  { %v547_v27 = vpop.eup %546  ;;  %v330_v28 = vpack.c.bf16 %v545_v26, %v541_v24 }
  0xfd   :  { %v549_v29 = vpop.eup %548  ;;  %v329_v30 = vpack.c.bf16 %v547_v27, %v543_v25 }
  0xfe   :  { %v551_v31 = vpop.eup %550  ;;  %v302_v32 = vadd.f32 1.0, %v549_v29 }
  0xff   :  { %v553_v33 = vpop.eup %552  ;;  %v300_v34 = vadd.f32 1.0, %v551_v31  ;;  %494 = vmatpush3.bf16.msra.mxu1 %v329_v30 }
 0x100   :  { %v555_v35 = vpop.eup %554  ;;  %564 = vrcp.f32 %v302_v32  ;;  %v303_v36 = vadd.f32 1.0, %v553_v33  ;;  %495 = vmatprep.subr.bf16.mxu1 %v605_v22 }
 0x101   :  { %v557_v37 = vpop.eup %556  ;;  %566 = vrcp.f32 %v300_v34  ;;  %v301_v38 = vadd.f32 1.0, %v555_v35 }
 0x102   :  { %v559_v39 = vpop.eup %558  ;;  %568 = vrcp.f32 %v303_v36 }
 0x103   :  { %v561_v40 = vpop.eup %560  ;;  %570 = vrcp.f32 %v301_v38  ;;  %496 = vmatpush3.bf16.msra.mxu1 %v330_v28 }
 0x104   :  { %v563_v41 = vpop.eup %562  ;;  %497 = vmatprep.subr.bf16.mxu1 %v605_v22  ;;  %v332_v42 = vpack.c.bf16 %v561_v40, %v557_v37 }
 0x105   :  { %v331_v43 = vpack.c.bf16 %v563_v41, %v559_v39 }
 0x107   :  { %498 = vmatpush3.bf16.msra.mxu1 %v331_v43 }
 0x108   :  { %499 = vmatprep.subr.bf16.mxu1 %v605_v22 }
 0x10a   :  { %v565_v44 = vpop.eup %564 }
 0x10b   :  { %v567_v45 = vpop.eup %566  ;;  %500 = vmatpush3.bf16.msra.mxu1 %v332_v42 }
 0x10c   :  { %v569_v46 = vpop.eup %568  ;;  %501 = vmatprep.subr.bf16.mxu1 %v605_v22 }
 0x10d   :  { %v571_v47 = vpop.eup %570  ;;  %v334_v48 = vpack.c.bf16 %v569_v46, %v565_v44 }
 0x10e   :  { %v333_v49 = vpack.c.bf16 %v571_v47, %v567_v45 }
 0x110   :  { %502 = vmatpush3.bf16.msra.mxu1 %v333_v49 }
 0x111   :  { %503 = vmatprep.subr.bf16.mxu1 %v605_v22  ;;  %v397_v22 = vshrl.u32 %v396_v60, 7 }
 0x113   :  { %v398_v62 = vsub.s32 %v395_v61, %v397_v22 }
 0x114   :  { %504 = vmatpush3.bf16.msra.mxu1 %v334_v48 }
 0x117   :  { %506 = vmatmul.mubr.msk.bf16.vlgmr.msra.gmra.mrb[0].mxu1 %vm341_vm2, %v328_v50 }
 0x1ea   :  { %v379_v52 = vpop.f32.mrb[0].mxu1 }
 0x1eb   :  { %v380_v53 = vadd.f32 %v379_v52, %v339_v51  ;;  %v507_v54 = vpop.f32.mrb[1].mxu1 }
 0x1ec   :  { %v382_v55 = vpop.f32.mrb[2].mxu1 }
 0x1ed   :  { %v460_v56 = vmul.f32 -1.442695, %v380_v53  ;;  %v508_v57 = vpop.f32.mrb[3].mxu1  ;;  %v399_v1 = vrot.slane %v380_v53, %v398_v62 }
 0x1ef   :  { %572 = vpow2.f32 %v460_v56  ;;  %v400_v2 = vcombine.high %v399_v1, %v399_v1 }
 0x1f1   :  { %v407_v3 = vrot.slane %v400_v2, %v398_v62 }
 0x1f3   :  { %v409_v7 = vsub.f32 %v29_v4, %v407_v3 }
 0x1f9   :  { %v573_v63 = vpop.eup %572 }
 0x1fa   :  { %v388_v0 = vadd.f32 1.0, %v573_v63 }
 0x1fc   :  { %574 = vrcp.f32 %v388_v0 }
 0x206   :  { %v575_v5 = vpop.eup %574 }
 0x207   :  { %v391_v6 = vmul.f32 1.703, %v575_v5 }
 0x209   :  { %v410_v8 = vmul.f32 %v409_v7, %v391_v6 }
 0x20b   :  { %v461_v9 = vmul.f32 -1.442695, %v410_v8 }
 0x20d   :  { %576 = vpow2.f32 %v461_v9 }
 0x217   :  { %v577_v10 = vpop.eup %576 }
 0x218   :  { %v414_v11 = vadd.f32 1.0, %v577_v10 }
 0x21a   :  { %578 = vrcp.f32 %v414_v11 }
 0x224   :  { %v579_v12 = vpop.eup %578 }
 0x225   :  { %418 = vst.msk [vmem:[#allocation2] sm:$0x1] %vm417_vm3, %v579_v12 }
 0x226   :  { %591 = shalt.err (!%p588_p4)
}
 0x227   :  { %s592_s18 = scalar_lea.hbm %s744_s6, 16 }
 0x228   :  { %p593_p5 = scmp.ne.s32.totalorder %s744_s6, %s592_s18  ;;  %p596_p6 = scmp.lt.u32.totalorder %s592_s18, %s744_s6 }
 0x22a   :  { %p598_p7 = pnand %p596_p6, %p593_p5 }
 0x22c   :  { %601 = shalt.err (!%p598_p7)
}
 0x22d   :  { %428 = dma.vmem_to_hbm [thread:$0]  %s426_s14, 16, %s744_s6, [#allocation3]  }
 0x22e   :  { %602 = dma.done.wait [#allocation3], 16  }
 0x22f   :  { %603 = vsyncadd [#allocation3], 4294967280 }
 0x230   :  { %432 = vsyncpa [#allocation3], 1 }

</bundles_post_ra>
